<compile_context>
chip_gen: v5e
topology: v5e:2x2
jax: 0.10.0
libtpu: 0.0.40
codegen_flags: <defaults>
</compile_context>

<pallas_src>
import numpy as np
import jax
import jax.numpy as jnp
from jax.experimental import pallas as pl
from jax.experimental.pallas import tpu as pltpu


def make_sinusoid_table(n_position: int, d_hid: int) -> jnp.ndarray:
    """Exact port of _get_sinusoid_encoding_table -> shape (1, n_position, d_hid), float32."""
    pos = np.arange(n_position, dtype=np.float64)[:, None]            # (P, 1)
    hid = np.arange(d_hid)                                             # (D,)
    denom = np.power(10000.0, 2 * (hid // 2) / d_hid)                  # (D,)
    table = pos / denom                                                # (P, D)
    table[:, 0::2] = np.sin(table[:, 0::2])
    table[:, 1::2] = np.cos(table[:, 1::2])
    return jnp.asarray(table[None, :, :], dtype=jnp.float32)           # (1, P, D)


def _add_pos_kernel(x_ref, pos_ref, o_ref):
    # x_ref: (TB, TC) lane-dense tile of the flattened input
    # pos_ref: (1, TC) matching slice of the flattened positional table
    #          (broadcast over the batch/row axis on the VPU)
    o_ref[...] = x_ref[...] + pos_ref[...]


def _largest_divisor_tile(n: int, base: int, max_tile: int) -> int:
    """Largest multiple of `base` that divides `n` and is <= max_tile (0 if none)."""
    if n % base != 0:
        return 0
    m = n // base
    best = 0
    k = 1
    while k * k <= m:
        if m % k == 0:
            for d in (k, m // k):
                cand = d * base
                if best < cand <= max_tile:
                    best = cand
        k += 1
    return best


# ~4 MiB per x tile: amortizes the ~0.35 us/grid-step overhead (>=85% of HBM
# roofline in the measured tiled-f32-add sweep) while keeping the
# (2 inputs + 1 output) x double-buffer footprint ~16-17 MiB — fits every
# generation's VMEM, including v7x's 64 MiB.
_TARGET_TILE_BYTES = 4 << 20
_VMEM_LIMIT_BYTES = 48 * 1024 * 1024
# Below this total size the XLA-fused broadcast-add beats a custom-call launch.
_MIN_PALLAS_BYTES = 1 << 20


def positional_encoding_forward(x: jnp.ndarray, pos_table: jnp.ndarray,
                                *, use_pallas: bool | None = None) -> jnp.ndarray:
    """x: (B, S, D); pos_table: (1, n_position, D). Returns x + pos_table[:, :S]."""
    B, S, D = x.shape
    pos_slice = pos_table[:, :S, :].astype(x.dtype)                    # (1, S, D)

    if use_pallas is None:
        use_pallas = x.size * x.dtype.itemsize >= _MIN_PALLAS_BYTES
    if not use_pallas:
        # Tiny problem: let XLA fuse the broadcast-add (strictly faster here).
        return x + pos_slice

    # ---- lane-dense flattened 2D view (free reshapes) ----
    C = S * D
    x2 = x.reshape(B, C)
    pos2 = pos_slice.reshape(1, C)
    itemsize = x.dtype.itemsize

    # ---- row (batch) tile: full B unless B is large and 8-divisible ----
    if B > 512 and B % 8 == 0:
        TB = _largest_divisor_tile(B, 8, 512) or B
    else:
        TB = B

    # ---- column tile: multiple of 128 that divides C, sized to the budget ----
    max_cols = max(128, _TARGET_TILE_BYTES // max(TB * itemsize, 1))
    TC = _largest_divisor_tile(C, 128, max_cols)
    if TC == 0:
        # S*D not a multiple of 128: fall back to the full (always-legal) last dim.
        # TODO(synk): ragged column tiling (pad + mask) for huge non-128-multiple S*D.
        TC = C

    grid = (C // TC, B // TB)  # column tiles outer, batch(row) tiles inner:
    #   the pos block index only changes when the column tile changes, so the
    #   pipeline does not re-fetch the pos table for every batch tile.

    out2 = pl.pallas_call(
        _add_pos_kernel,
        out_shape=jax.ShapeDtypeStruct((B, C), x.dtype),
        grid_spec=pltpu.PrefetchScalarGridSpec(
            num_scalar_prefetch=0,
            grid=grid,
            in_specs=[
                pl.BlockSpec((TB, TC), lambda ci, bi: (bi, ci)),   # x tile
                pl.BlockSpec((1, TC), lambda ci, bi: (0, ci)),     # shared pos tile
            ],
            out_specs=pl.BlockSpec((TB, TC), lambda ci, bi: (bi, ci)),
        ),
        compiler_params=pltpu.CompilerParams(
            dimension_semantics=("parallel", "parallel"),   # shards across v7x's 2 TCs
            vmem_limit_bytes=_VMEM_LIMIT_BYTES,
        ),
    )(x2, pos2)

    return out2.reshape(B, S, D)


if __name__ == "__main__":
    B, S, D = 2, 8, 32
    n_position = 200

    key = jax.random.PRNGKey(0)
    x = jax.random.normal(key, (B, S, D), dtype=jnp.float32)

    pos_table = make_sinusoid_table(n_position, D)

    # Force the Pallas path so the kernel itself is exercised at the demo shape
    # (the default auto-dispatch would hand this tiny case to fused XLA).
    out = positional_encoding_forward(x, pos_table, use_pallas=True)
    out = jax.block_until_ready(out)

    # correctness check against plain-JAX reference
    ref = x + pos_table[:, :S, :]
    np.testing.assert_allclose(np.asarray(out), np.asarray(ref), rtol=1e-6, atol=1e-6)

    print("KERNEL_OK")
</pallas_src>

<mosaic_0001>
module attributes {stable_mosaic.version = 11 : i64} {
  func.func @_add_pos_kernel(%arg0: i32, %arg1: i32, %arg2: memref<2x256xf32, #tpu.memory_space<vmem>>, %arg3: memref<1x256xf32, #tpu.memory_space<vmem>>, %arg4: memref<2x256xf32, #tpu.memory_space<vmem>>) attributes {dimension_semantics = [#tpu.dimension_semantics<parallel>, #tpu.dimension_semantics<parallel>], iteration_bounds = array<i64: 1, 1>, scalar_prefetch = 0 : i64, scratch_operands = 0 : i64, tpu.core_type = #tpu.core_type<tc>, window_params = [{transform_indices = @transform_0, window_bounds = array<i64: 2, 256>}, {transform_indices = @transform_1, window_bounds = array<i64: 1, 256>}, {transform_indices = @transform_2, window_bounds = array<i64: 2, 256>}]} {
    %c0 = arith.constant 0 : index
    %c0_0 = arith.constant 0 : index
    %0 = vector.load %arg2[%c0, %c0_0] : memref<2x256xf32, #tpu.memory_space<vmem>>, vector<2x256xf32>
    %c0_1 = arith.constant 0 : index
    %c0_2 = arith.constant 0 : index
    %1 = vector.load %arg3[%c0_1, %c0_2] : memref<1x256xf32, #tpu.memory_space<vmem>>, vector<1x256xf32>
    %2 = vector.broadcast %1 : vector<1x256xf32> to vector<2x256xf32>
    %3 = arith.addf %0, %2 : vector<2x256xf32>
    %c0_3 = arith.constant 0 : index
    %c0_4 = arith.constant 0 : index
    %4 = vector.load %arg4[%c0_3, %c0_4] : memref<2x256xf32, #tpu.memory_space<vmem>>, vector<2x256xf32>
    tpu.vector_store %arg4[%c0_3, %c0_4], %3 {strides = array<i32>} : memref<2x256xf32, #tpu.memory_space<vmem>>, vector<2x256xf32>,
    return
  }
  func.func @transform_0(%arg0: i32, %arg1: i32) -> (i32, i32) {
    %c0_i32 = arith.constant 0 : i32
    return %arg1, %arg0 : i32, i32
  }
  func.func @transform_1(%arg0: i32, %arg1: i32) -> (i32, i32) {
    %c0_i32 = arith.constant 0 : i32
    %c0_i32_0 = arith.constant 0 : i32
    return %c0_i32, %arg0 : i32, i32
  }
  func.func @transform_2(%arg0: i32, %arg1: i32) -> (i32, i32) {
    %c0_i32 = arith.constant 0 : i32
    return %arg1, %arg0 : i32, i32
  }
}

</mosaic_0001>

<bundles_post_ra>
// kernel: tpu_custom_call.1
= control target key start
LH: loop header
LB: loop body
LE: loop exit
PB: predicated region body
PF: predicated region fallthrough
CT: control target
= control target key end

     0   :  { %7 = vsyncpa [#allocation3], 0  ;;  %s177_s0 = inlined_call_operand.hbm [shape: f32[2,256], index: 0, kind: input, shape index: {}]   ;;  %s178_s1 = inlined_call_operand.hbm [shape: f32[1,256], index: 1, kind: input, shape index: {}]   ;;  %s179_s2 = inlined_call_operand.hbm [shape: f32[2,256], index: 2, kind: output, shape index: {}]  }
   0x1   :  { %8 = vsyncpa [#allocation6], 0 }
   0x2   :  { %9 = vsyncpa [#allocation4], 0  ;;  %s15_s11 = sshll.u32 %s177_s0, 4  ;;  %s150_s12 = smov [#allocation2]   ;;  %s16_s11 = int_to_ptr.hbm [resolvable:$true] %s15_s11 }
   0x3   :  { %s17_s13 = sshll.u32 %s150_s12, 4  ;;  %s26_s16 = sshll.u32 %s178_s1, 4  ;;  %s18_s13 = int_to_ptr.vmem [resolvable:$true] %s17_s13  ;;  %s27_s16 = int_to_ptr.hbm [resolvable:$true] %s26_s16 }
   0x4   :  { %20 = dma.hbm_to_vmem [thread:$0]  %s16_s11, 64, %s18_s13, [#allocation3]  }
   0x5   :  { %s151_s17 = smov [#allocation5]  }
   0x6   :  { %s28_s18 = sshll.u32 %s151_s17, 4  ;;  %s29_s18 = int_to_ptr.vmem [resolvable:$true] %s28_s18 }
   0x7   :  { %31 = dma.hbm_to_vmem [thread:$0]  %s27_s16, 32, %s29_s18, [#allocation6]  }
   0x8   :  { %144 = dma.done.wait [#allocation3], 64  }
   0x9   :  { %145 = vsyncadd [#allocation3], 4294967232 }
   0xa   :  { %146 = dma.done.wait [#allocation6], 32  }
   0xb   :  { %147 = vsyncadd [#allocation6], 4294967264  ;;  %v41_v0 = vld [vmem:[#allocation5] sm:$0x3]  ;;  %vm46_vm0 = vcmask 1041408   ;;  %s152_s0 = smov [#allocation7]  }
   0xc   :  { %v43_v1 = vperm.slane %v41_v0, 0  ;;  %v44_v2 = vperm.slane %v41_v0, 1  ;;  %v40_v3 = vld [vmem:[#allocation2] sm:$0xf]  ;;  %s56_s19 = sshll.u32 %s152_s0, 4  ;;  %s58_s21 = sshll.u32 %s179_s2, 4  ;;  %s57_s19 = int_to_ptr.vmem [resolvable:$true] %s56_s19  ;;  %s59_s21 = int_to_ptr.hbm [resolvable:$true] %s58_s21 }
   0xe   :  { %v45_v4 = vrot.slane %v44_v2, 6 }
  0x10   :  { %v47_v5 = vsel %vm46_vm0, %v43_v1, %v45_v4 }
  0x11   :  { %v49_v6 = vadd.f32 %v47_v5, %v40_v3 }
  0x13   :  { %50 = vst [vmem:[#allocation7] sm:$0xf] %v49_v6 }
  0x14   :  { %61 = dma.vmem_to_hbm [thread:$0]  %s57_s19, 64, %s59_s21, [#allocation4]  }
  0x15   :  { %148 = dma.done.wait [#allocation4], 64  }
  0x16   :  { %149 = vsyncadd [#allocation4], 4294967232 }
  0x17   :  { %66 = vsyncpa [#allocation3], 1 }
  0x18   :  { %67 = vsyncpa [#allocation6], 1 }
  0x19   :  { %68 = vsyncpa [#allocation4], 1 }

</bundles_post_ra>
